<compile_context>
chip_gen: v7x
topology: tpu7x:2x2x1
jax: 0.10.0
libtpu: 0.0.40
codegen_flags: <defaults>
</compile_context>

<pallas_src>
import functools

import jax
import jax.numpy as jnp
import numpy as np
from jax.experimental import pallas as pl
from jax.experimental.pallas import tpu as pltpu


# ----------------------------- Pallas kernel ---------------------------------

def _gat_attend_into(x, w, att_src_bd, att_dst_bd, mask, neg, heads, out_ch, dst_ref):
    """One GATConv message-passing step (pre-bias, pre-activation).

    Writes each head's aggregation directly into lane-slices of dst_ref.

    x:           [N, F_in]
    w:           [F_in, H*C]
    att_src_bd:  [H*C, H]   block-diagonal: att_src_bd[h*C+c, h] = att_src[h, c]
    att_dst_bd:  [H*C, H]
    mask:        [N, N] bool, mask[i, j] = edge j -> i exists (self-loops included)
    dst_ref:     [N, H*C] VMEM ref
    """
    hproj = jnp.dot(x, w, preferred_element_type=jnp.float32)               # [N, H*C] (MXU)
    # All heads' attention scores in two MXU dots (no per-head reductions).
    a_src = jnp.dot(hproj, att_src_bd, preferred_element_type=jnp.float32)  # [N, H]
    a_dst = jnp.dot(hproj, att_dst_bd, preferred_element_type=jnp.float32)  # [N, H]
    a_src_t = a_src.T                                                       # [H, N] single transpose

    for hh in range(heads):                                                  # static, small H
        e = a_dst[:, hh:hh + 1] + a_src_t[hh:hh + 1, :]                      # [N, N]: a_dst[i]+a_src[j]
        e = jnp.where(e >= 0, e, 0.2 * e)                                    # LeakyReLU(0.2)
        e = jnp.where(mask, e, neg)                                          # mask non-edges
        m = jnp.max(e, axis=1, keepdims=True)
        p = jnp.where(mask, jnp.exp(e - m), 0.0)
        denom = jnp.maximum(jnp.sum(p, axis=1, keepdims=True), 1e-20)        # guard zero-edge rows
        alpha = p * pl.reciprocal(denom, approx=True)                        # softmax (EUP recip)
        dst_ref[:, hh * out_ch:(hh + 1) * out_ch] = jnp.dot(
            alpha, hproj[:, hh * out_ch:(hh + 1) * out_ch],
            preferred_element_type=jnp.float32)


def _gat_fused_kernel(x_ref, adj_ref,
                      w1_ref, asrc1_ref, adst1_ref, b1_ref,
                      w2_ref, asrc2_ref, adst2_ref, b2_ref,
                      out_ref, h_scratch,
                      *, heads1, out1, heads2, out2):
    """Fused 2-layer GAT forward (eval mode): layer1 -> ELU -> layer2 -> log_softmax."""
    # Hoisted once, reused by both layers and all heads.
    mask = adj_ref[...].astype(jnp.float32) > 0                              # [N, N] bool
    neg = jnp.float32(-1e30)

    x = x_ref[...].astype(jnp.float32)

    # ---- layer 1 (heads concatenated) ----
    _gat_attend_into(x, w1_ref[...], asrc1_ref[...], adst1_ref[...],
                     mask, neg, heads1, out1, h_scratch)
    h_pre = h_scratch[...] + b1_ref[...]
    h_act = jnp.where(h_pre > 0, h_pre, jnp.exp(h_pre) - 1.0)                # F.elu

    # ---- layer 2 ----
    _gat_attend_into(h_act, w2_ref[...], asrc2_ref[...], adst2_ref[...],
                     mask, neg, heads2, out2, out_ref)
    o = out_ref[...] + b2_ref[...]
    mx = jnp.max(o, axis=1, keepdims=True)
    s = o - mx
    out_ref[...] = s - jnp.log(jnp.sum(jnp.exp(s), axis=1, keepdims=True))   # F.log_softmax(dim=1)


# ------------------------------ wrappers --------------------------------------

def _block_diag_att(att):
    """[H, C] attention vector -> block-diagonal [H*C, H] matrix for a single MXU dot."""
    h, c = att.shape
    eye = jnp.eye(h, dtype=att.dtype)
    return (att[:, :, None] * eye[:, None, :]).reshape(h * c, h)


def _dense_adj(edge_index, n):
    # edge_index[0] = src, edge_index[1] = dst ; messages flow src -> dst.
    adj = jnp.zeros((n, n), jnp.int32).at[edge_index[1], edge_index[0]].set(1)
    adj = jnp.maximum(adj, jnp.eye(n, dtype=jnp.int32))                      # add self-loops
    return adj.astype(jnp.int8)                                              # 4x smaller in HBM/VMEM


def gat_forward(x, edge_index, params, *, hidden_dim, num_classes, head_1, head_2):
    n = x.shape[0]
    adj = _dense_adj(edge_index, n)
    asrc1 = _block_diag_att(params["att_src1"])
    adst1 = _block_diag_att(params["att_dst1"])
    asrc2 = _block_diag_att(params["att_src2"])
    adst2 = _block_diag_att(params["att_dst2"])

    kernel = functools.partial(_gat_fused_kernel, heads1=head_1, out1=hidden_dim,
                               heads2=head_2, out2=num_classes)
    # F.dropout(training=False) == identity, so no dropout inputs.
    return pl.pallas_call(
        kernel,
        out_shape=jax.ShapeDtypeStruct((n, head_2 * num_classes), jnp.float32),
        in_specs=[pl.BlockSpec(memory_space=pltpu.MemorySpace.VMEM) for _ in range(10)],
        out_specs=pl.BlockSpec(memory_space=pltpu.MemorySpace.VMEM),
        scratch_shapes=[pltpu.VMEM((n, head_1 * hidden_dim), jnp.float32)],
    )(x, adj,
      params["w1"], asrc1, adst1, params["b1"],
      params["w2"], asrc2, adst2, params["b2"])


# -------------------------- pure-JAX reference -------------------------------

def _gat_layer_ref(x, w, att_src, att_dst, bias, adj, heads, out_ch, activation):
    n = x.shape[0]
    h = (x @ w).reshape(n, heads, out_ch)
    a_src = jnp.sum(h * att_src[None], axis=-1)                     # [N, H]
    a_dst = jnp.sum(h * att_dst[None], axis=-1)                     # [N, H]
    e = a_dst[:, None, :] + a_src[None, :, :]                       # [N_dst, N_src, H]
    e = jnp.where(e >= 0, e, 0.2 * e)
    e = jnp.where(adj[:, :, None] > 0, e, -1e30)
    e = e - jnp.max(e, axis=1, keepdims=True)
    p = jnp.where(adj[:, :, None] > 0, jnp.exp(e), 0.0)
    alpha = p / jnp.sum(p, axis=1, keepdims=True)
    out = jnp.einsum("ijh,jhc->ihc", alpha, h).reshape(n, heads * out_ch) + bias
    if activation == "elu":
        out = jnp.where(out > 0, out, jnp.exp(out) - 1.0)
    elif activation == "log_softmax":
        out = out - jax.scipy.special.logsumexp(out, axis=1, keepdims=True)
    return out


def gat_forward_ref(x, edge_index, params, *, hidden_dim, num_classes, head_1, head_2):
    adj = _dense_adj(edge_index, x.shape[0]).astype(jnp.float32)
    h = _gat_layer_ref(x, params["w1"], params["att_src1"], params["att_dst1"],
                       params["b1"], adj, head_1, hidden_dim, "elu")
    return _gat_layer_ref(h, params["w2"], params["att_src2"], params["att_dst2"],
                          params["b2"], adj, head_2, num_classes, "log_softmax")


# ---------------------------------- main --------------------------------------

if __name__ == "__main__":
    N, INPUT_DIM, HIDDEN, NUM_CLASSES = 8, 16, 8, 4
    HEAD_1, HEAD_2 = 4, 1

    key = jax.random.PRNGKey(0)
    k = jax.random.split(key, 10)

    x = jax.random.normal(k[0], (N, INPUT_DIM), jnp.float32)
    src = jnp.array([0, 1, 2, 3, 4, 5, 6, 7, 1, 2, 3, 4, 5, 6, 7, 0, 0, 3], jnp.int32)
    dst = jnp.array([1, 2, 3, 4, 5, 6, 7, 0, 0, 1, 2, 3, 4, 5, 6, 7, 4, 7], jnp.int32)
    edge_index = jnp.stack([src, dst])                              # [2, E]

    scale = 0.2
    params = {
        "w1":       scale * jax.random.normal(k[1], (INPUT_DIM, HEAD_1 * HIDDEN), jnp.float32),
        "att_src1": scale * jax.random.normal(k[2], (HEAD_1, HIDDEN), jnp.float32),
        "att_dst1": scale * jax.random.normal(k[3], (HEAD_1, HIDDEN), jnp.float32),
        "b1":       scale * jax.random.normal(k[4], (1, HEAD_1 * HIDDEN), jnp.float32),
        "w2":       scale * jax.random.normal(k[5], (HEAD_1 * HIDDEN, HEAD_2 * NUM_CLASSES), jnp.float32),
        "att_src2": scale * jax.random.normal(k[6], (HEAD_2, NUM_CLASSES), jnp.float32),
        "att_dst2": scale * jax.random.normal(k[7], (HEAD_2, NUM_CLASSES), jnp.float32),
        "b2":       scale * jax.random.normal(k[8], (1, HEAD_2 * NUM_CLASSES), jnp.float32),
    }

    out = gat_forward(x, edge_index, params, hidden_dim=HIDDEN, num_classes=NUM_CLASSES,
                      head_1=HEAD_1, head_2=HEAD_2)
    out = jax.block_until_ready(out)

    ref = gat_forward_ref(x, edge_index, params, hidden_dim=HIDDEN, num_classes=NUM_CLASSES,
                          head_1=HEAD_1, head_2=HEAD_2)
    # Tolerance loosened vs. the exact-divide reference because the kernel uses the
    # EUP approximate reciprocal for the attention softmax (still catches real bugs).
    np.testing.assert_allclose(np.asarray(out), np.asarray(ref), rtol=1e-2, atol=1e-2)

    print("KERNEL_OK")
</pallas_src>

<mosaic_0001>
module attributes {stable_mosaic.version = 11 : i64} {
  func.func @_gat_fused_kernel(%arg0: memref<8x16xf32, #tpu.memory_space<vmem>>, %arg1: memref<8x8xi8, #tpu.memory_space<vmem>>, %arg2: memref<16x32xf32, #tpu.memory_space<vmem>>, %arg3: memref<32x4xf32, #tpu.memory_space<vmem>>, %arg4: memref<32x4xf32, #tpu.memory_space<vmem>>, %arg5: memref<1x32xf32, #tpu.memory_space<vmem>>, %arg6: memref<32x4xf32, #tpu.memory_space<vmem>>, %arg7: memref<4x1xf32, #tpu.memory_space<vmem>>, %arg8: memref<4x1xf32, #tpu.memory_space<vmem>>, %arg9: memref<1x4xf32, #tpu.memory_space<vmem>>, %arg10: memref<8x4xf32, #tpu.memory_space<vmem>>, %arg11: memref<8x32xf32, #tpu.memory_space<vmem>>) attributes {dimension_semantics = [], scalar_prefetch = 0 : i64, scratch_operands = 1 : i64, tpu.core_type = #tpu.core_type<tc>} {
    %c0 = arith.constant 0 : index
    %c0_0 = arith.constant 0 : index
    %0 = vector.load %arg1[%c0, %c0_0] : memref<8x8xi8, #tpu.memory_space<vmem>>, vector<8x8xi8>
    %1 = arith.sitofp %0 : vector<8x8xi8> to vector<8x8xf32>
    %cst = arith.constant 0.000000e+00 : f32
    %2 = vector.broadcast %cst : f32 to vector<8x8xf32>
    %3 = arith.cmpf ogt, %1, %2 : vector<8x8xf32>
    %c0_1 = arith.constant 0 : index
    %c0_2 = arith.constant 0 : index
    %4 = vector.load %arg0[%c0_1, %c0_2] : memref<8x16xf32, #tpu.memory_space<vmem>>, vector<8x16xf32>
    %c0_3 = arith.constant 0 : index
    %c0_4 = arith.constant 0 : index
    %5 = vector.load %arg2[%c0_3, %c0_4] : memref<16x32xf32, #tpu.memory_space<vmem>>, vector<16x32xf32>
    %c0_5 = arith.constant 0 : index
    %c0_6 = arith.constant 0 : index
    %6 = vector.load %arg3[%c0_5, %c0_6] : memref<32x4xf32, #tpu.memory_space<vmem>>, vector<32x4xf32>
    %c0_7 = arith.constant 0 : index
    %c0_8 = arith.constant 0 : index
    %7 = vector.load %arg4[%c0_7, %c0_8] : memref<32x4xf32, #tpu.memory_space<vmem>>, vector<32x4xf32>
    %cst_9 = arith.constant dense<0.000000e+00> : vector<8x32xf32>
    %8 = tpu.matmul %4, %5, %cst_9 {dimension_numbers = #tpu.dot_dimension_numbers<[1], [0], [0], [1], [0, 0, 1, 1], [], []>} : vector<8x16xf32>, vector<16x32xf32>, vector<8x32xf32> -> vector<8x32xf32>
    %cst_10 = arith.constant dense<0.000000e+00> : vector<8x4xf32>
    %9 = tpu.matmul %8, %6, %cst_10 {dimension_numbers = #tpu.dot_dimension_numbers<[1], [0], [0], [1], [0, 0, 1, 1], [], []>} : vector<8x32xf32>, vector<32x4xf32>, vector<8x4xf32> -> vector<8x4xf32>
    %cst_11 = arith.constant dense<0.000000e+00> : vector<8x4xf32>
    %10 = tpu.matmul %8, %7, %cst_11 {dimension_numbers = #tpu.dot_dimension_numbers<[1], [0], [0], [1], [0, 0, 1, 1], [], []>} : vector<8x32xf32>, vector<32x4xf32>, vector<8x4xf32> -> vector<8x4xf32>
    %11 = tpu.transpose %9, [1, 0] : vector<8x4xf32> -> vector<4x8xf32>
    %12 = vector.extract_strided_slice %10 {offsets = [0, 0], sizes = [8, 1], strides = [1, 1]} : vector<8x4xf32> to vector<8x1xf32>
    %13 = vector.extract_strided_slice %11 {offsets = [0, 0], sizes = [1, 8], strides = [1, 1]} : vector<4x8xf32> to vector<1x8xf32>
    %14 = vector.broadcast %12 : vector<8x1xf32> to vector<8x8xf32>
    %15 = vector.broadcast %13 : vector<1x8xf32> to vector<8x8xf32>
    %16 = arith.addf %14, %15 : vector<8x8xf32>
    %cst_12 = arith.constant 0.000000e+00 : f32
    %17 = vector.broadcast %cst_12 : f32 to vector<8x8xf32>
    %18 = arith.cmpf oge, %16, %17 : vector<8x8xf32>
    %cst_13 = arith.constant 2.000000e-01 : f32
    %19 = vector.broadcast %cst_13 : f32 to vector<8x8xf32>
    %20 = arith.mulf %19, %16 : vector<8x8xf32>
    %21 = arith.select %18, %16, %20 : vector<8x8xi1>, vector<8x8xf32>
    %cst_14 = arith.constant -1.000000e+30 : f32
    %22 = vector.broadcast %cst_14 : f32 to vector<8x8xf32>
    %23 = arith.select %3, %21, %22 : vector<8x8xi1>, vector<8x8xf32>
    %cst_15 = arith.constant dense<0xFF800000> : vector<8xf32>
    %24 = vector.multi_reduction <maximumf>, %23, %cst_15 [1] : vector<8x8xf32> to vector<8xf32>
    %25 = vector.shape_cast %24 : vector<8xf32> to vector<8x1xf32>
    %26 = vector.broadcast %25 : vector<8x1xf32> to vector<8x8xf32>
    %27 = arith.subf %23, %26 : vector<8x8xf32>
    %28 = math.exp %27 : vector<8x8xf32>
    %cst_16 = arith.constant 0.000000e+00 : f32
    %29 = vector.broadcast %cst_16 : f32 to vector<8x8xf32>
    %30 = arith.select %3, %28, %29 : vector<8x8xi1>, vector<8x8xf32>
    %cst_17 = arith.constant dense<0.000000e+00> : vector<8xf32>
    %31 = vector.multi_reduction <add>, %30, %cst_17 [1] : vector<8x8xf32> to vector<8xf32>
    %32 = vector.shape_cast %31 : vector<8xf32> to vector<8x1xf32>
    %cst_18 = arith.constant 9.99999968E-21 : f32
    %33 = vector.broadcast %cst_18 : f32 to vector<8x1xf32>
    %34 = arith.maximumf %32, %33 : vector<8x1xf32>
    %35 = tpu.reciprocal %34 {approx = true} : vector<8x1xf32> -> vector<8x1xf32>
    %36 = vector.broadcast %35 : vector<8x1xf32> to vector<8x8xf32>
    %37 = arith.mulf %30, %36 : vector<8x8xf32>
    %38 = vector.extract_strided_slice %8 {offsets = [0, 0], sizes = [8, 8], strides = [1, 1]} : vector<8x32xf32> to vector<8x8xf32>
    %cst_19 = arith.constant dense<0.000000e+00> : vector<8x8xf32>
    %39 = tpu.matmul %37, %38, %cst_19 {dimension_numbers = #tpu.dot_dimension_numbers<[1], [0], [0], [1], [0, 0, 1, 1], [], []>} : vector<8x8xf32>, vector<8x8xf32>, vector<8x8xf32> -> vector<8x8xf32>
    %c0_20 = arith.constant 0 : index
    %c0_21 = arith.constant 0 : index
    %40 = vector.load %arg11[%c0_20, %c0_21] : memref<8x32xf32, #tpu.memory_space<vmem>>, vector<8x8xf32>
    tpu.vector_store %arg11[%c0_20, %c0_21], %39 {strides = array<i32>} : memref<8x32xf32, #tpu.memory_space<vmem>>, vector<8x8xf32>,
    %41 = vector.extract_strided_slice %10 {offsets = [0, 1], sizes = [8, 1], strides = [1, 1]} : vector<8x4xf32> to vector<8x1xf32>
    %42 = vector.extract_strided_slice %11 {offsets = [1, 0], sizes = [1, 8], strides = [1, 1]} : vector<4x8xf32> to vector<1x8xf32>
    %43 = vector.broadcast %41 : vector<8x1xf32> to vector<8x8xf32>
    %44 = vector.broadcast %42 : vector<1x8xf32> to vector<8x8xf32>
    %45 = arith.addf %43, %44 : vector<8x8xf32>
    %cst_22 = arith.constant 0.000000e+00 : f32
    %46 = vector.broadcast %cst_22 : f32 to vector<8x8xf32>
    %47 = arith.cmpf oge, %45, %46 : vector<8x8xf32>
    %cst_23 = arith.constant 2.000000e-01 : f32
    %48 = vector.broadcast %cst_23 : f32 to vector<8x8xf32>
    %49 = arith.mulf %48, %45 : vector<8x8xf32>
    %50 = arith.select %47, %45, %49 : vector<8x8xi1>, vector<8x8xf32>
    %cst_24 = arith.constant -1.000000e+30 : f32
    %51 = vector.broadcast %cst_24 : f32 to vector<8x8xf32>
    %52 = arith.select %3, %50, %51 : vector<8x8xi1>, vector<8x8xf32>
    %cst_25 = arith.constant dense<0xFF800000> : vector<8xf32>
    %53 = vector.multi_reduction <maximumf>, %52, %cst_25 [1] : vector<8x8xf32> to vector<8xf32>
    %54 = vector.shape_cast %53 : vector<8xf32> to vector<8x1xf32>
    %55 = vector.broadcast %54 : vector<8x1xf32> to vector<8x8xf32>
    %56 = arith.subf %52, %55 : vector<8x8xf32>
    %57 = math.exp %56 : vector<8x8xf32>
    %cst_26 = arith.constant 0.000000e+00 : f32
    %58 = vector.broadcast %cst_26 : f32 to vector<8x8xf32>
    %59 = arith.select %3, %57, %58 : vector<8x8xi1>, vector<8x8xf32>
    %cst_27 = arith.constant dense<0.000000e+00> : vector<8xf32>
    %60 = vector.multi_reduction <add>, %59, %cst_27 [1] : vector<8x8xf32> to vector<8xf32>
    %61 = vector.shape_cast %60 : vector<8xf32> to vector<8x1xf32>
    %cst_28 = arith.constant 9.99999968E-21 : f32
    %62 = vector.broadcast %cst_28 : f32 to vector<8x1xf32>
    %63 = arith.maximumf %61, %62 : vector<8x1xf32>
    %64 = tpu.reciprocal %63 {approx = true} : vector<8x1xf32> -> vector<8x1xf32>
    %65 = vector.broadcast %64 : vector<8x1xf32> to vector<8x8xf32>
    %66 = arith.mulf %59, %65 : vector<8x8xf32>
    %67 = vector.extract_strided_slice %8 {offsets = [0, 8], sizes = [8, 8], strides = [1, 1]} : vector<8x32xf32> to vector<8x8xf32>
    %cst_29 = arith.constant dense<0.000000e+00> : vector<8x8xf32>
    %68 = tpu.matmul %66, %67, %cst_29 {dimension_numbers = #tpu.dot_dimension_numbers<[1], [0], [0], [1], [0, 0, 1, 1], [], []>} : vector<8x8xf32>, vector<8x8xf32>, vector<8x8xf32> -> vector<8x8xf32>
    %c0_30 = arith.constant 0 : index
    %c8 = arith.constant 8 : index
    %69 = vector.load %arg11[%c0_30, %c8] : memref<8x32xf32, #tpu.memory_space<vmem>>, vector<8x8xf32>
    tpu.vector_store %arg11[%c0_30, %c8], %68 {strides = array<i32>} : memref<8x32xf32, #tpu.memory_space<vmem>>, vector<8x8xf32>,
    %70 = vector.extract_strided_slice %10 {offsets = [0, 2], sizes = [8, 1], strides = [1, 1]} : vector<8x4xf32> to vector<8x1xf32>
    %71 = vector.extract_strided_slice %11 {offsets = [2, 0], sizes = [1, 8], strides = [1, 1]} : vector<4x8xf32> to vector<1x8xf32>
    %72 = vector.broadcast %70 : vector<8x1xf32> to vector<8x8xf32>
    %73 = vector.broadcast %71 : vector<1x8xf32> to vector<8x8xf32>
    %74 = arith.addf %72, %73 : vector<8x8xf32>
    %cst_31 = arith.constant 0.000000e+00 : f32
    %75 = vector.broadcast %cst_31 : f32 to vector<8x8xf32>
    %76 = arith.cmpf oge, %74, %75 : vector<8x8xf32>
    %cst_32 = arith.constant 2.000000e-01 : f32
    %77 = vector.broadcast %cst_32 : f32 to vector<8x8xf32>
    %78 = arith.mulf %77, %74 : vector<8x8xf32>
    %79 = arith.select %76, %74, %78 : vector<8x8xi1>, vector<8x8xf32>
    %cst_33 = arith.constant -1.000000e+30 : f32
    %80 = vector.broadcast %cst_33 : f32 to vector<8x8xf32>
    %81 = arith.select %3, %79, %80 : vector<8x8xi1>, vector<8x8xf32>
    %cst_34 = arith.constant dense<0xFF800000> : vector<8xf32>
    %82 = vector.multi_reduction <maximumf>, %81, %cst_34 [1] : vector<8x8xf32> to vector<8xf32>
    %83 = vector.shape_cast %82 : vector<8xf32> to vector<8x1xf32>
    %84 = vector.broadcast %83 : vector<8x1xf32> to vector<8x8xf32>
    %85 = arith.subf %81, %84 : vector<8x8xf32>
    %86 = math.exp %85 : vector<8x8xf32>
    %cst_35 = arith.constant 0.000000e+00 : f32
    %87 = vector.broadcast %cst_35 : f32 to vector<8x8xf32>
    %88 = arith.select %3, %86, %87 : vector<8x8xi1>, vector<8x8xf32>
    %cst_36 = arith.constant dense<0.000000e+00> : vector<8xf32>
    %89 = vector.multi_reduction <add>, %88, %cst_36 [1] : vector<8x8xf32> to vector<8xf32>
    %90 = vector.shape_cast %89 : vector<8xf32> to vector<8x1xf32>
    %cst_37 = arith.constant 9.99999968E-21 : f32
    %91 = vector.broadcast %cst_37 : f32 to vector<8x1xf32>
    %92 = arith.maximumf %90, %91 : vector<8x1xf32>
    %93 = tpu.reciprocal %92 {approx = true} : vector<8x1xf32> -> vector<8x1xf32>
    %94 = vector.broadcast %93 : vector<8x1xf32> to vector<8x8xf32>
    %95 = arith.mulf %88, %94 : vector<8x8xf32>
    %96 = vector.extract_strided_slice %8 {offsets = [0, 16], sizes = [8, 8], strides = [1, 1]} : vector<8x32xf32> to vector<8x8xf32>
    %cst_38 = arith.constant dense<0.000000e+00> : vector<8x8xf32>
    %97 = tpu.matmul %95, %96, %cst_38 {dimension_numbers = #tpu.dot_dimension_numbers<[1], [0], [0], [1], [0, 0, 1, 1], [], []>} : vector<8x8xf32>, vector<8x8xf32>, vector<8x8xf32> -> vector<8x8xf32>
    %c0_39 = arith.constant 0 : index
    %c16 = arith.constant 16 : index
    %98 = vector.load %arg11[%c0_39, %c16] : memref<8x32xf32, #tpu.memory_space<vmem>>, vector<8x8xf32>
    tpu.vector_store %arg11[%c0_39, %c16], %97 {strides = array<i32>} : memref<8x32xf32, #tpu.memory_space<vmem>>, vector<8x8xf32>,
    %99 = vector.extract_strided_slice %10 {offsets = [0, 3], sizes = [8, 1], strides = [1, 1]} : vector<8x4xf32> to vector<8x1xf32>
    %100 = vector.extract_strided_slice %11 {offsets = [3, 0], sizes = [1, 8], strides = [1, 1]} : vector<4x8xf32> to vector<1x8xf32>
    %101 = vector.broadcast %99 : vector<8x1xf32> to vector<8x8xf32>
    %102 = vector.broadcast %100 : vector<1x8xf32> to vector<8x8xf32>
    %103 = arith.addf %101, %102 : vector<8x8xf32>
    %cst_40 = arith.constant 0.000000e+00 : f32
    %104 = vector.broadcast %cst_40 : f32 to vector<8x8xf32>
    %105 = arith.cmpf oge, %103, %104 : vector<8x8xf32>
    %cst_41 = arith.constant 2.000000e-01 : f32
    %106 = vector.broadcast %cst_41 : f32 to vector<8x8xf32>
    %107 = arith.mulf %106, %103 : vector<8x8xf32>
    %108 = arith.select %105, %103, %107 : vector<8x8xi1>, vector<8x8xf32>
    %cst_42 = arith.constant -1.000000e+30 : f32
    %109 = vector.broadcast %cst_42 : f32 to vector<8x8xf32>
    %110 = arith.select %3, %108, %109 : vector<8x8xi1>, vector<8x8xf32>
    %cst_43 = arith.constant dense<0xFF800000> : vector<8xf32>
    %111 = vector.multi_reduction <maximumf>, %110, %cst_43 [1] : vector<8x8xf32> to vector<8xf32>
    %112 = vector.shape_cast %111 : vector<8xf32> to vector<8x1xf32>
    %113 = vector.broadcast %112 : vector<8x1xf32> to vector<8x8xf32>
    %114 = arith.subf %110, %113 : vector<8x8xf32>
    %115 = math.exp %114 : vector<8x8xf32>
    %cst_44 = arith.constant 0.000000e+00 : f32
    %116 = vector.broadcast %cst_44 : f32 to vector<8x8xf32>
    %117 = arith.select %3, %115, %116 : vector<8x8xi1>, vector<8x8xf32>
    %cst_45 = arith.constant dense<0.000000e+00> : vector<8xf32>
    %118 = vector.multi_reduction <add>, %117, %cst_45 [1] : vector<8x8xf32> to vector<8xf32>
    %119 = vector.shape_cast %118 : vector<8xf32> to vector<8x1xf32>
    %cst_46 = arith.constant 9.99999968E-21 : f32
    %120 = vector.broadcast %cst_46 : f32 to vector<8x1xf32>
    %121 = arith.maximumf %119, %120 : vector<8x1xf32>
    %122 = tpu.reciprocal %121 {approx = true} : vector<8x1xf32> -> vector<8x1xf32>
    %123 = vector.broadcast %122 : vector<8x1xf32> to vector<8x8xf32>
    %124 = arith.mulf %117, %123 : vector<8x8xf32>
    %125 = vector.extract_strided_slice %8 {offsets = [0, 24], sizes = [8, 8], strides = [1, 1]} : vector<8x32xf32> to vector<8x8xf32>
    %cst_47 = arith.constant dense<0.000000e+00> : vector<8x8xf32>
    %126 = tpu.matmul %124, %125, %cst_47 {dimension_numbers = #tpu.dot_dimension_numbers<[1], [0], [0], [1], [0, 0, 1, 1], [], []>} : vector<8x8xf32>, vector<8x8xf32>, vector<8x8xf32> -> vector<8x8xf32>
    %c0_48 = arith.constant 0 : index
    %c24 = arith.constant 24 : index
    %127 = vector.load %arg11[%c0_48, %c24] : memref<8x32xf32, #tpu.memory_space<vmem>>, vector<8x8xf32>
    tpu.vector_store %arg11[%c0_48, %c24], %126 {strides = array<i32>} : memref<8x32xf32, #tpu.memory_space<vmem>>, vector<8x8xf32>,
    %c0_49 = arith.constant 0 : index
    %c0_50 = arith.constant 0 : index
    %128 = vector.load %arg11[%c0_49, %c0_50] : memref<8x32xf32, #tpu.memory_space<vmem>>, vector<8x32xf32>
    %c0_51 = arith.constant 0 : index
    %c0_52 = arith.constant 0 : index
    %129 = vector.load %arg5[%c0_51, %c0_52] : memref<1x32xf32, #tpu.memory_space<vmem>>, vector<1x32xf32>
    %130 = vector.broadcast %129 : vector<1x32xf32> to vector<8x32xf32>
    %131 = arith.addf %128, %130 : vector<8x32xf32>
    %cst_53 = arith.constant 0.000000e+00 : f32
    %132 = vector.broadcast %cst_53 : f32 to vector<8x32xf32>
    %133 = arith.cmpf ogt, %131, %132 : vector<8x32xf32>
    %134 = math.exp %131 : vector<8x32xf32>
    %cst_54 = arith.constant 1.000000e+00 : f32
    %135 = vector.broadcast %cst_54 : f32 to vector<8x32xf32>
    %136 = arith.subf %134, %135 : vector<8x32xf32>
    %137 = arith.select %133, %131, %136 : vector<8x32xi1>, vector<8x32xf32>
    %c0_55 = arith.constant 0 : index
    %c0_56 = arith.constant 0 : index
    %138 = vector.load %arg6[%c0_55, %c0_56] : memref<32x4xf32, #tpu.memory_space<vmem>>, vector<32x4xf32>
    %c0_57 = arith.constant 0 : index
    %c0_58 = arith.constant 0 : index
    %139 = vector.load %arg7[%c0_57, %c0_58] : memref<4x1xf32, #tpu.memory_space<vmem>>, vector<4x1xf32>
    %c0_59 = arith.constant 0 : index
    %c0_60 = arith.constant 0 : index
    %140 = vector.load %arg8[%c0_59, %c0_60] : memref<4x1xf32, #tpu.memory_space<vmem>>, vector<4x1xf32>
    %cst_61 = arith.constant dense<0.000000e+00> : vector<8x4xf32>
    %141 = tpu.matmul %137, %138, %cst_61 {dimension_numbers = #tpu.dot_dimension_numbers<[1], [0], [0], [1], [0, 0, 1, 1], [], []>} : vector<8x32xf32>, vector<32x4xf32>, vector<8x4xf32> -> vector<8x4xf32>
    %cst_62 = arith.constant dense<0.000000e+00> : vector<8x1xf32>
    %142 = tpu.matmul %141, %139, %cst_62 {dimension_numbers = #tpu.dot_dimension_numbers<[1], [0], [0], [1], [0, 0, 1, 1], [], []>} : vector<8x4xf32>, vector<4x1xf32>, vector<8x1xf32> -> vector<8x1xf32>
    %cst_63 = arith.constant dense<0.000000e+00> : vector<8x1xf32>
    %143 = tpu.matmul %141, %140, %cst_63 {dimension_numbers = #tpu.dot_dimension_numbers<[1], [0], [0], [1], [0, 0, 1, 1], [], []>} : vector<8x4xf32>, vector<4x1xf32>, vector<8x1xf32> -> vector<8x1xf32>
    %144 = tpu.transpose %142, [1, 0] : vector<8x1xf32> -> vector<1x8xf32>
    %145 = vector.broadcast %143 : vector<8x1xf32> to vector<8x8xf32>
    %146 = vector.broadcast %144 : vector<1x8xf32> to vector<8x8xf32>
    %147 = arith.addf %145, %146 : vector<8x8xf32>
    %cst_64 = arith.constant 0.000000e+00 : f32
    %148 = vector.broadcast %cst_64 : f32 to vector<8x8xf32>
    %149 = arith.cmpf oge, %147, %148 : vector<8x8xf32>
    %cst_65 = arith.constant 2.000000e-01 : f32
    %150 = vector.broadcast %cst_65 : f32 to vector<8x8xf32>
    %151 = arith.mulf %150, %147 : vector<8x8xf32>
    %152 = arith.select %149, %147, %151 : vector<8x8xi1>, vector<8x8xf32>
    %cst_66 = arith.constant -1.000000e+30 : f32
    %153 = vector.broadcast %cst_66 : f32 to vector<8x8xf32>
    %154 = arith.select %3, %152, %153 : vector<8x8xi1>, vector<8x8xf32>
    %cst_67 = arith.constant dense<0xFF800000> : vector<8xf32>
    %155 = vector.multi_reduction <maximumf>, %154, %cst_67 [1] : vector<8x8xf32> to vector<8xf32>
    %156 = vector.shape_cast %155 : vector<8xf32> to vector<8x1xf32>
    %157 = vector.broadcast %156 : vector<8x1xf32> to vector<8x8xf32>
    %158 = arith.subf %154, %157 : vector<8x8xf32>
    %159 = math.exp %158 : vector<8x8xf32>
    %cst_68 = arith.constant 0.000000e+00 : f32
    %160 = vector.broadcast %cst_68 : f32 to vector<8x8xf32>
    %161 = arith.select %3, %159, %160 : vector<8x8xi1>, vector<8x8xf32>
    %cst_69 = arith.constant dense<0.000000e+00> : vector<8xf32>
    %162 = vector.multi_reduction <add>, %161, %cst_69 [1] : vector<8x8xf32> to vector<8xf32>
    %163 = vector.shape_cast %162 : vector<8xf32> to vector<8x1xf32>
    %cst_70 = arith.constant 9.99999968E-21 : f32
    %164 = vector.broadcast %cst_70 : f32 to vector<8x1xf32>
    %165 = arith.maximumf %163, %164 : vector<8x1xf32>
    %166 = tpu.reciprocal %165 {approx = true} : vector<8x1xf32> -> vector<8x1xf32>
    %167 = vector.broadcast %166 : vector<8x1xf32> to vector<8x8xf32>
    %168 = arith.mulf %161, %167 : vector<8x8xf32>
    %cst_71 = arith.constant dense<0.000000e+00> : vector<8x4xf32>
    %169 = tpu.matmul %168, %141, %cst_71 {dimension_numbers = #tpu.dot_dimension_numbers<[1], [0], [0], [1], [0, 0, 1, 1], [], []>} : vector<8x8xf32>, vector<8x4xf32>, vector<8x4xf32> -> vector<8x4xf32>
    %c0_72 = arith.constant 0 : index
    %c0_73 = arith.constant 0 : index
    %170 = vector.load %arg10[%c0_72, %c0_73] : memref<8x4xf32, #tpu.memory_space<vmem>>, vector<8x4xf32>
    tpu.vector_store %arg10[%c0_72, %c0_73], %169 {strides = array<i32>} : memref<8x4xf32, #tpu.memory_space<vmem>>, vector<8x4xf32>,
    %c0_74 = arith.constant 0 : index
    %c0_75 = arith.constant 0 : index
    %171 = vector.load %arg10[%c0_74, %c0_75] : memref<8x4xf32, #tpu.memory_space<vmem>>, vector<8x4xf32>
    %c0_76 = arith.constant 0 : index
    %c0_77 = arith.constant 0 : index
    %172 = vector.load %arg9[%c0_76, %c0_77] : memref<1x4xf32, #tpu.memory_space<vmem>>, vector<1x4xf32>
    %173 = vector.broadcast %172 : vector<1x4xf32> to vector<8x4xf32>
    %174 = arith.addf %171, %173 : vector<8x4xf32>
    %cst_78 = arith.constant dense<0xFF800000> : vector<8xf32>
    %175 = vector.multi_reduction <maximumf>, %174, %cst_78 [1] : vector<8x4xf32> to vector<8xf32>
    %176 = vector.shape_cast %175 : vector<8xf32> to vector<8x1xf32>
    %177 = vector.broadcast %176 : vector<8x1xf32> to vector<8x4xf32>
    %178 = arith.subf %174, %177 : vector<8x4xf32>
    %179 = math.exp %178 : vector<8x4xf32>
    %cst_79 = arith.constant dense<0.000000e+00> : vector<8xf32>
    %180 = vector.multi_reduction <add>, %179, %cst_79 [1] : vector<8x4xf32> to vector<8xf32>
    %181 = vector.shape_cast %180 : vector<8xf32> to vector<8x1xf32>
    %182 = math.log %181 : vector<8x1xf32>
    %183 = vector.broadcast %182 : vector<8x1xf32> to vector<8x4xf32>
    %184 = arith.subf %178, %183 : vector<8x4xf32>
    %c0_80 = arith.constant 0 : index
    %c0_81 = arith.constant 0 : index
    %185 = vector.load %arg10[%c0_80, %c0_81] : memref<8x4xf32, #tpu.memory_space<vmem>>, vector<8x4xf32>
    tpu.vector_store %arg10[%c0_80, %c0_81], %184 {strides = array<i32>} : memref<8x4xf32, #tpu.memory_space<vmem>>, vector<8x4xf32>,
    return
  }
}

</mosaic_0001>

<bundles_post_ra>
// kernel: tpu_custom_call.1
= control target key start
LH: loop header
LB: loop body
LE: loop exit
PB: predicated region body
PF: predicated region fallthrough
CT: control target
= control target key end

     0   :  { %v1317_v0 = vmov 0.0|0.0   ;;  %vm1318_vm0 = vmmov 0   ;;  %v1319_v3 = vmov 0.0   ;;  %vm50_vm1 = vcmask 130048   ;;  %s1326_s14 = smov 104   ;;  %s1328_s23 = smov 16   ;;  %s1558_s2 = inlined_call_operand.vmem [shape: f32[16,32], index: 2, kind: input, shape index: {}]   ;;  %s1559_s3 = inlined_call_operand.vmem [shape: f32[32,4], index: 3, kind: input, shape index: {}]   ;;  %s1560_s4 = inlined_call_operand.vmem [shape: f32[32,4], index: 4, kind: input, shape index: {}]   ;;  %s1561_s0 = inlined_call_operand.vmem [shape: f32[8,16], index: 0, kind: input, shape index: {}]   ;;  %s1562_s1 = inlined_call_operand.vmem [shape: s8[8,8], index: 1, kind: input, shape index: {}]   ;;  %s1563_s6 = inlined_call_operand.vmem [shape: f32[32,4], index: 6, kind: input, shape index: {}]   ;;  %s1564_s7 = inlined_call_operand.vmem [shape: f32[4,1], index: 7, kind: input, shape index: {}]   ;;  %s1565_s5 = inlined_call_operand.vmem [shape: f32[1,32], index: 5, kind: input, shape index: {}]   ;;  %s1566_s8 = inlined_call_operand.vmem [shape: f32[4,1], index: 8, kind: input, shape index: {}]   ;;  %s1567_s10 = inlined_call_operand.vmem [shape: f32[8,4], index: 10, kind: output, shape index: {}]   ;;  %s1568_s9 = inlined_call_operand.vmem [shape: f32[1,4], index: 9, kind: input, shape index: {}]  }
   0x1   :  { %1252 = vmatprep.subr.bf16.mxu0 %v1317_v0  ;;  %v40_v1 = vld [vmem:[%s1558_s2] sm:$0xff]  ;;  %v41_v2 = vld [vmem:[%s1558_s2 + $0x8] sm:$0xff]  ;;  %1181 = vmatprep.mubr.msk.f32.mxu0 %vm1318_vm0, %v1319_v3  ;;  %v44_v10 = vld [vmem:[%s1559_s3 + $0x10] sm:$0xff]  ;;  %v1320_v18 = vmov 2   ;;  %v1321_v19 = vmov 0   ;;  %vm124_vm2 = vcmask 261120   ;;  %v305_v28 = vlaneseq }
   0x2   :  { %v1253_v4 = vpack.c.bf16 %v41_v2, %v40_v1  ;;  %1255 = vmatprep.subr.bf16.mxu1 %v1317_v0  ;;  %v42_v5 = vld [vmem:[%s1559_s3] sm:$0xff]  ;;  %v43_v6 = vld [vmem:[%s1559_s3 + $0x8] sm:$0xff]  ;;  %1192 = vmatprep.mubr.msk.f32.mxu1 %vm1318_vm0, %v1319_v3  ;;  %v45_v11 = vld [vmem:[%s1559_s3 + $0x18] sm:$0xff]  ;;  %v1322_v26 = vmov 3   ;;  %v1323_v27 = vmov 1   ;;  %vm314_vm6 = vcmask 64512  }
   0x3   :  { %v46_v7 = vld [vmem:[%s1560_s4] sm:$0xff]  ;;  %v1256_v8 = vpack.c.bf16 %v43_v6, %v42_v5  ;;  %v47_v9 = vld [vmem:[%s1560_s4 + $0x8] sm:$0xff]  ;;  %v1259_v14 = vpack.c.bf16 %v45_v11, %v44_v10  ;;  %v48_v15 = vld [vmem:[%s1560_s4 + $0x10] sm:$0xff]  ;;  %1288 = vset.pattern.permute.xlu1 %v1320_v18  ;;  %1286 = vset.pattern.permute.xlu0 %v1321_v19  ;;  %v1443_v30 = vshrl.u32 %v305_v28, 7  ;;  %s1327_s2 = smov 8   ;;  %s1329_s24 = smov 24  }
   0x4   :  { %1254 = vmatpush3.bf16.msra.mxu0 %v1253_v4  ;;  %v39_v12 = vld [vmem:[%s1561_s0] sm:$0xff]  ;;  %v1262_v13 = vpack.c.bf16 %v47_v9, %v46_v7  ;;  %v49_v16 = vld [vmem:[%s1560_s4 + $0x18] sm:$0xff]  ;;  %s1325_s4 = smov 120   ;;  %vm823_vm9 = vcmask 1043456   ;;  %vm508_vm10 = vcmask 130112   ;;  %vm616_vm11 = vcmask 195712  }
   0x5   :  { %1257 = vmatpush3.bf16.msra.mxu1 %v1256_v8  ;;  %1261 = vmatprep.subr.bf16.mxu0 %v1317_v0  ;;  %v1265_v17 = vpack.c.bf16 %v49_v16, %v48_v15  ;;  %v35_v31 = vld [vmem:[%s1562_s1] sm:$0x3]  ;;  %v307_v35 = vsub.s32 0, %v1443_v30  ;;  %v408_v36 = vsub.s32 1, %v1443_v30  ;;  %v516_v37 = vsub.s32 2, %v1443_v30  ;;  %s1324_s1 = smov 112  }
   0x6   :  { %1258 = vmatprep.subr.bf16.mxu1 %v1317_v0  ;;  %v36_v34 = vunpack.c.0.s8 %v35_v31  ;;  %v624_v38 = vsub.s32 3, %v1443_v30  ;;  %vm724_vm12 = vcmask 261312   ;;  %vm819_vm14 = vcmask 31744  }
   0x7   :  { %1182 = vmatmul.mubr.msk.f32.vlgmr.msra.gmra.mrb[0].mxu0 %vm50_vm1, %v39_v12 }
   0x8   :  { %1263 = vmatpush3.bf16.msra.mxu0 %v1262_v13  ;;  %1203 = vmatprep.mubr.msk.f32.mxu0 %vm1318_vm0, %v1319_v3  ;;  %v1452_v40 = vcvt.s32.f32 %v36_v34 }
   0x9   :  { %1260 = vmatpush3.bf16.msra.mxu1 %v1259_v14  ;;  %1264 = vmatprep.subr.bf16.mxu0 %v1317_v0 }
   0xa   :  { %1206 = vmatprep.subr.mxu1 %v1319_v3  ;;  %vm38_vm3 = vcmp.gt.f32.partialorder %v1452_v40, 0.0  ;;  %v1144_v40 = vld [vmem:[%s1568_s9] ss:$0 sm:$0xff] }
   0xc   :  { %1266 = vmatpush3.bf16.msra.mxu0 %v1265_v17 }
   0xd   :  { %1211 = vmatprep.subr.mxu0 %v1319_v3 }
  0xda   :  { %v1431_v20 = vpop.f32.mrb[0].mxu0 }
  0xdb   :  { %v1183_v21 = vpop.f32.mrb[1].mxu0  ;;  %1193 = vmatmul.mubr.msk.f32.vlgmr.msra.gmra.mrb[0].mxu1 %vm124_vm2, %v1431_v20  ;;  %1204 = vmatmul.mubr.msk.f32.vlgmr.msra.gmra.mrb[2].mxu0 %vm124_vm2, %v1431_v20 }
  0xdc   :  { %1207 = vmatpush3.msra.mxu1 %v1431_v20  ;;  %1208 = vmatprep.mubr.msk.f32.mxu1 %vm1318_vm0, %v1319_v3 }
  0xdd   :  { %1216 = vmatprep.subr.mxu1 %v1319_v3  ;;  %1213 = vmatprep.mubr.msk.f32.mxu0 %vm1318_vm0, %v1319_v3 }
 0x1ae   :  { %v194_v22 = vpop.f32.mrb[0].mxu1  ;;  %v264_v23 = vpop.f32.mrb[2].mxu0 }
 0x1af   :  { %v1194_v24 = vpop.f32.mrb[1].mxu1  ;;  %511 = vperm.xlu1 %1288, %v264_v23   ;;  %302 = vperm.xlu0 %1286, %v264_v23   ;;  %v1205_v25 = vpop.f32.mrb[3].mxu0 }
 0x1b3   :  { %1289 = vset.pattern.permute.xlu1 %v1322_v26  ;;  %1287 = vset.pattern.permute.xlu0 %v1323_v27 }
 0x1b4   :  { %619 = vperm.xlu1 %1289, %v264_v23   ;;  %403 = vperm.xlu0 %1287, %v264_v23  }
 0x1b8   :  { %1290 = vset.pattern.permute.xlu0 %v1321_v19 }
 0x1dd   :  { %268 = vxpose.xlu1.b32.start.end [1/1] (short) (narrow) %v194_v22, 8 }
 0x22e   :  { %v512_v29 = vpop.permute.xlu1 %511  ;;  %v303_v32 = vpop.permute.xlu0 %302 }
 0x233   :  { %v620_v33 = vpop.permute.xlu1 %619  ;;  %v404_v45 = vpop.permute.xlu0 %403 }
 0x25d   :  { %v284_v39 = vpop.trf.xlu1 }
 0x25e   :  { %v308_v41 = vrot.slane %v284_v39, %v307_v35  ;;  %v409_v42 = vrot.slane %v284_v39, %v408_v36  ;;  %v517_v43 = vrot.slane %v284_v39, %v516_v37  ;;  %v625_v44 = vrot.slane %v284_v39, %v624_v38 }
 0x260   :  { %v626_v46 = vadd.f32 %v625_v44, %v620_v33  ;;  %v309_v47 = vadd.f32 %v308_v41, %v303_v32  ;;  %v410_v48 = vadd.f32 %v409_v42, %v404_v45  ;;  %v518_v49 = vadd.f32 %v517_v43, %v512_v29 }
 0x262   :  { %vm627_vm4 = vcmp.ge.f32.partialorder %v626_v46, 0.0  ;;  %v628_v50 = vmul.f32 0.2, %v626_v46  ;;  %vm310_vm5 = vcmp.ge.f32.partialorder %v309_v47, 0.0  ;;  %v311_v51 = vmul.f32 0.2, %v309_v47 }
 0x263   :  { %vm411_vm7 = vcmp.ge.f32.partialorder %v410_v48, 0.0  ;;  %v412_v52 = vmul.f32 0.2, %v410_v48  ;;  %v520_v55 = vmul.f32 0.2, %v518_v49  ;;  %vm519_vm8 = vcmp.ge.f32.partialorder %v518_v49, 0.0 }
 0x264   :  { %v629_v53 = vsel %vm627_vm4, %v626_v46, %v628_v50  ;;  %v312_v54 = vsel %vm310_vm5, %v309_v47, %v311_v51 }
 0x265   :  { %v630_v56 = vsel %vm38_vm3, %v629_v53, -1e+30  ;;  %v313_v57 = vsel %vm38_vm3, %v312_v54, -1e+30  ;;  %v413_v58 = vsel %vm411_vm7, %v410_v48, %v412_v52  ;;  %v521_v62 = vsel %vm519_vm8, %v518_v49, %v520_v55  ;;  %v740_v52 = vld [vmem:[%s1563_s6] sm:$0xff]  ;;  %v741_v53 = vld [vmem:[%s1563_s6 + $0x8] sm:$0xff] }
 0x266   :  { %v631_v59 = vsel %vm314_vm6, %v630_v56, -inf  ;;  %v315_v60 = vsel %vm314_vm6, %v313_v57, -inf  ;;  %v414_v61 = vsel %vm38_vm3, %v413_v58, -1e+30  ;;  %v522_v1 = vsel %vm38_vm3, %v521_v62, -1e+30 }
 0x267   :  { %632 = vmax.xlane.f32.xlu1 %v631_v59  ;;  %316 = vmax.xlane.f32.xlu0 %v315_v60  ;;  %v415_v63 = vsel %vm314_vm6, %v414_v61, -inf  ;;  %v523_v2 = vsel %vm314_vm6, %v522_v1, -inf  ;;  %v742_v54 = vld [vmem:[%s1563_s6 + $0x10] sm:$0xff]  ;;  %v1268_v55 = vpack.c.bf16 %v741_v53, %v740_v52 }
 0x26b   :  { %416 = vmax.xlane.f32.xlu0 %v415_v63 }
 0x26f   :  { %524 = vmax.xlane.f32.xlu0 %v523_v2 }
 0x278   :  { %536 = vrot.lane.b32.xlu1 %v1431_v20, %s1324_s1 }
 0x285   :  { %428 = vrot.lane.b32.xlu0 %v1431_v20, %s1325_s4 }
 0x2f4   :  { %v317_v4 = vpop.xlane.xlu0 %316  ;;  %v633_v6 = vpop.xlane.xlu1 %632 }
 0x2f5   :  { %v318_v5 = vsub.f32 %v313_v57, %v317_v4  ;;  %v634_v10 = vsub.f32 %v630_v56, %v633_v6  ;;  %v743_v56 = vld [vmem:[%s1563_s6 + $0x18] sm:$0xff] }
 0x2f6   :  { %v1271_v58 = vpack.c.bf16 %v743_v56, %v742_v54 }
 0x2f7   :  { %v319_v7 = vmul.f32 1.442695, %v318_v5  ;;  %v635_v14 = vmul.f32 1.442695, %v634_v10  ;;  %v1136_v5 = vld [vmem:[%s1565_s5] ss:$0 sm:$0xff] }
 0x2f8   :  { %v417_v8 = vpop.xlane.xlu0 %416  ;;  %v537_v43 = vpop.permute.xlu1 %536 }
 0x2f9   :  { %v418_v9 = vsub.f32 %v414_v61, %v417_v8  ;;  %1291 = vpow2.f32 %v319_v7 }
 0x2fb   :  { %v419_v11 = vmul.f32 1.442695, %v418_v9 }
 0x2fc   :  { %v525_v12 = vpop.xlane.xlu0 %524 }
 0x2fd   :  { %1293 = vpow2.f32 %v419_v11  ;;  %v526_v13 = vsub.f32 %v522_v1, %v525_v12  ;;  %v744_v1 = vld [vmem:[%s1564_s7] sm:$0xf] }
 0x2fe   :  { %v745_v12 = vld [vmem:[%s1566_s8] sm:$0xf] }
 0x2ff   :  { %v527_v15 = vmul.f32 1.442695, %v526_v13 }
 0x300   :  { %v429_v16 = vpop.permute.xlu0 %428 }
 0x301   :  { %1295 = vpow2.f32 %v527_v15  ;;  %1212 = vmatpush3.msra.mxu0 %v429_v16 }
 0x302   :  { %1297 = vpow2.f32 %v635_v14  ;;  %1221 = vmatprep.subr.mxu0 %v1319_v3 }
 0x303   :  { %v1292_v17 = vpop.eup %1291 }
 0x304   :  { %v321_v18 = vsel %vm38_vm3, %v1292_v17, 0.0 }
 0x305   :  { %v322_v19 = vsel %vm314_vm6, %v321_v18, 0.0 }
 0x306   :  { %323 = vadd.xlane.f32.xlu0 %v322_v19 }
 0x307   :  { %v1294_v21 = vpop.eup %1293 }
 0x308   :  { %v421_v22 = vsel %vm38_vm3, %v1294_v21, 0.0 }
 0x309   :  { %v422_v23 = vsel %vm314_vm6, %v421_v22, 0.0 }
 0x30a   :  { %423 = vadd.xlane.f32.xlu0 %v422_v23 }
 0x30b   :  { %v1296_v24 = vpop.eup %1295 }
 0x30c   :  { %v1298_v25 = vpop.eup %1297  ;;  %v529_v26 = vsel %vm38_vm3, %v1296_v24, 0.0 }
 0x30d   :  { %v530_v27 = vsel %vm314_vm6, %v529_v26, 0.0  ;;  %v637_v28 = vsel %vm38_vm3, %v1298_v25, 0.0 }
 0x30e   :  { %531 = vadd.xlane.f32.xlu0 %v530_v27  ;;  %v638_v29 = vsel %vm314_vm6, %v637_v28, 0.0 }
 0x312   :  { %639 = vadd.xlane.f32.xlu0 %v638_v29 }
 0x328   :  { %644 = vrot.lane.b32.xlu0 %v1431_v20, %s1326_s14 }
 0x393   :  { %v324_v31 = vpop.xlane.xlu0 %323 }
 0x394   :  { %v325_v32 = vmax.f32 %v324_v31, 1e-20 }
 0x396   :  { %1299 = vrcp.f32 %v325_v32 }
 0x397   :  { %v424_v33 = vpop.xlane.xlu0 %423 }
 0x398   :  { %v425_v34 = vmax.f32 %v424_v33, 1e-20 }
 0x39a   :  { %1301 = vrcp.f32 %v425_v34 }
 0x39b   :  { %v532_v36 = vpop.xlane.xlu0 %531 }
 0x39c   :  { %v533_v37 = vmax.f32 %v532_v36, 1e-20 }
 0x39e   :  { %1303 = vrcp.f32 %v533_v37 }
 0x39f   :  { %v640_v38 = vpop.xlane.xlu0 %639 }
 0x3a0   :  { %v1300_v39 = vpop.eup %1299  ;;  %v641_v41 = vmax.f32 %v640_v38, 1e-20 }
 0x3a1   :  { %v327_v42 = vmul.f32 %v1300_v39, %v321_v18 }
 0x3a2   :  { %1305 = vrcp.f32 %v641_v41 }
 0x3a3   :  { %1209 = vmatmul.mubr.msk.f32.vlgmr.msra.gmra.mrb[2].mxu1 %vm314_vm6, %v327_v42  ;;  %v645_v45 = vpop.permute.xlu0 %644 }
 0x3a4   :  { %v1302_v44 = vpop.eup %1301  ;;  %1217 = vmatpush3.msra.mxu1 %v537_v43  ;;  %1218 = vmatprep.mubr.msk.f32.mxu1 %vm1318_vm0, %v1319_v3 }
 0x3a5   :  { %v427_v20 = vmul.f32 %v1302_v44, %v421_v22  ;;  %1267 = vmatprep.subr.bf16.mxu1 %v1317_v0 }
 0x3a7   :  { %1214 = vmatmul.mubr.msk.f32.vlgmr.msra.gmra.mrb[4].mxu0 %vm314_vm6, %v427_v20 }
 0x3a8   :  { %v1304_v46 = vpop.eup %1303  ;;  %1222 = vmatpush3.msra.mxu0 %v645_v45  ;;  %1223 = vmatprep.mubr.msk.f32.mxu0 %vm1318_vm0, %v1319_v3 }
 0x3a9   :  { %v535_v47 = vmul.f32 %v1304_v46, %v529_v26  ;;  %1237 = vmatprep.subr.mxu0 %v1319_v3 }
 0x3ab   :  { %1219 = vmatmul.mubr.msk.f32.vlgmr.msra.gmra.mrb[4].mxu1 %vm314_vm6, %v535_v47 }
 0x3ac   :  { %v1306_v48 = vpop.eup %1305  ;;  %1234 = vmatprep.mubr.msk.f32.mxu1 %vm1318_vm0, %v1319_v3  ;;  %1269 = vmatpush3.bf16.msra.mxu1 %v1268_v55 }
 0x3ad   :  { %v643_v49 = vmul.f32 %v1306_v48, %v637_v28  ;;  %1270 = vmatprep.subr.bf16.mxu1 %v1317_v0 }
 0x3af   :  { %1224 = vmatmul.mubr.msk.f32.vlgmr.msra.gmra.mrb[6].mxu0 %vm314_vm6, %v643_v49 }
 0x3b0   :  { %1239 = vmatprep.mubr.msk.f32.mxu0 %vm1318_vm0, %v1319_v3  ;;  %1272 = vmatpush3.bf16.msra.mxu1 %v1271_v58 }
 0x3b1   :  { %1247 = vmatprep.subr.mxu1 %v1319_v3  ;;  %1238 = vmatpush3.msk.msra.mxu0 %vm823_vm9, %v744_v1 }
 0x3b2   :  { %1242 = vmatprep.subr.mxu0 %v1319_v3 }
 0x476   :  { %v397_v50 = vpop.f32.mrb[2].mxu1 }
 0x477   :  { %401 = vst.msk [vmem:[#allocation2] sm:$0xff] %vm314_vm6, %v397_v50  ;;  %v1210_v51 = vpop.f32.mrb[3].mxu1 }
 0x47a   :  { %v500_v57 = vpop.f32.mrb[4].mxu0 }
 0x47b   :  { %505 = vrot.lane.b32.xlu0 %v500_v57, %s1327_s2  ;;  %v1215_v59 = vpop.f32.mrb[5].mxu0 }
 0x47e   :  { %v608_v60 = vpop.f32.mrb[4].mxu1 }
 0x47f   :  { %v1220_v61 = vpop.f32.mrb[5].mxu1  ;;  %613 = vrot.lane.b32.xlu0 %v608_v60, %s1328_s23 }
 0x482   :  { %v716_v62 = vpop.f32.mrb[6].mxu0 }
 0x483   :  { %721 = vrot.lane.b32.xlu0 %v716_v62, %s1329_s24  ;;  %v1225_v63 = vpop.f32.mrb[7].mxu0 }
 0x4ed   :  { %v506_v0 = vpop.permute.xlu0 %505 }
 0x4ee   :  { %509 = vst.msk [vmem:[#allocation2] sm:$0xff] %vm508_vm10, %v506_v0 }
 0x4f1   :  { %v614_v2 = vpop.permute.xlu0 %613 }
 0x4f2   :  { %617 = vst.msk [vmem:[#allocation2] sm:$0xff] %vm616_vm11, %v614_v2 }
 0x4f5   :  { %v722_v4 = vpop.permute.xlu0 %721 }
 0x4f6   :  { %725 = vst.msk [vmem:[#allocation2] sm:$0xff] %vm724_vm12, %v722_v4 }
 0x4fd   :  { %v726_v6 = vld [vmem:[#allocation2] sm:$0xff] }
 0x4fe   :  { %v734_v7 = vadd.f32 %v1136_v5, %v726_v6 }
 0x500   :  { %v736_v8 = vmul.f32 1.442695, %v734_v7  ;;  %vm735_vm13 = vcmp.gt.f32.partialorder %v734_v7, 0.0 }
 0x502   :  { %1307 = vpow2.f32 %v736_v8 }
 0x50c   :  { %v1308_v9 = vpop.eup %1307 }
 0x50d   :  { %v1137_v10 = vadd.f32 -1.0, %v1308_v9 }
 0x50f   :  { %v739_v11 = vsel %vm735_vm13, %v734_v7, %v1137_v10 }
 0x510   :  { %1235 = vmatmul.mubr.msk.f32.vlgmr.msra.gmra.mrb[6].mxu1 %vm124_vm2, %v739_v11 }
 0x511   :  { %1249 = vmatprep.mubr.msk.f32.mxu1 %vm1318_vm0, %v1319_v3 }
 0x5e3   :  { %v815_v13 = vpop.f32.mrb[6].mxu1 }
 0x5e4   :  { %v1236_v14 = vpop.f32.mrb[7].mxu1  ;;  %1240 = vmatmul.mubr.msk.f32.vlgmr.msra.gmra.mrb[8].mxu0 %vm819_vm14, %v815_v13  ;;  %1248 = vmatpush3.msra.mxu1 %v815_v13 }
 0x5e5   :  { %1243 = vmatpush3.msk.msra.mxu0 %vm823_vm9, %v745_v12  ;;  %1244 = vmatprep.mubr.msk.f32.mxu0 %vm1318_vm0, %v1319_v3 }
 0x5e8   :  { %1245 = vmatmul.mubr.msk.f32.vlgmr.msra.gmra.mrb[10].mxu0 %vm819_vm14, %v815_v13 }
 0x6b7   :  { %v893_v15 = vpop.f32.mrb[8].mxu0 }
 0x6b8   :  { %970 = vxpose.xlu1.b32.start.end [1/1] (short) (narrow) %v893_v15, 8  ;;  %v1241_v16 = vpop.f32.mrb[9].mxu0 }
 0x6bb   :  { %v966_v17 = vpop.f32.mrb[10].mxu0 }
 0x6bc   :  { %1004 = vperm.xlu0 %1290, %v966_v17   ;;  %v1246_v18 = vpop.f32.mrb[11].mxu0 }
 0x738   :  { %v986_v19 = vpop.trf.xlu1 }
 0x739   :  { %v1010_v21 = vrot.slane %v986_v19, %v307_v35 }
 0x73b   :  { %v1005_v22 = vpop.permute.xlu0 %1004 }
 0x73c   :  { %v1011_v23 = vadd.f32 %v1010_v21, %v1005_v22 }
 0x73e   :  { %v1013_v24 = vmul.f32 0.2, %v1011_v23  ;;  %vm1012_vm15 = vcmp.ge.f32.partialorder %v1011_v23, 0.0 }
 0x740   :  { %v1014_v25 = vsel %vm1012_vm15, %v1011_v23, %v1013_v24 }
 0x741   :  { %v1015_v3 = vsel %vm38_vm3, %v1014_v25, -1e+30 }
 0x742   :  { %v1016_v26 = vsel %vm314_vm6, %v1015_v3, -inf }
 0x743   :  { %1017 = vmax.xlane.f32.xlu0 %v1016_v26 }
 0x7d0   :  { %v1018_v27 = vpop.xlane.xlu0 %1017 }
 0x7d1   :  { %v1019_v28 = vsub.f32 %v1015_v3, %v1018_v27 }
 0x7d3   :  { %v1020_v29 = vmul.f32 1.442695, %v1019_v28 }
 0x7d5   :  { %1309 = vpow2.f32 %v1020_v29 }
 0x7df   :  { %v1310_v31 = vpop.eup %1309 }
 0x7e0   :  { %v1022_v30 = vsel %vm38_vm3, %v1310_v31, 0.0 }
 0x7e1   :  { %v1023_v35 = vsel %vm314_vm6, %v1022_v30, 0.0 }
 0x7e2   :  { %1024 = vadd.xlane.f32.xlu0 %v1023_v35 }
 0x86f   :  { %v1025_v32 = vpop.xlane.xlu0 %1024 }
 0x870   :  { %v1026_v33 = vmax.f32 %v1025_v32, 1e-20 }
 0x872   :  { %1311 = vrcp.f32 %v1026_v33 }
 0x87c   :  { %v1312_v34 = vpop.eup %1311 }
 0x87d   :  { %v1028_v36 = vmul.f32 %v1312_v34, %v1022_v30 }
 0x87f   :  { %1250 = vmatmul.mubr.msk.f32.vlgmr.msra.gmra.mrb[8].mxu1 %vm314_vm6, %v1028_v36 }
 0x952   :  { %v1098_v37 = vpop.f32.mrb[8].mxu1 }
 0x953   :  { %1102 = vst.msk [vmem:[%s1567_s10] sm:$0xff] %vm819_vm14, %v1098_v37  ;;  %v1251_v38 = vpop.f32.mrb[9].mxu1 }
 0x95a   :  { %v1103_v39 = vld [vmem:[%s1567_s10] sm:$0xff] }
 0x95b   :  { %v1111_v41 = vadd.f32 %v1144_v40, %v1103_v39 }
 0x95d   :  { %v1112_v42 = vsel %vm819_vm14, %v1111_v41, -inf }
 0x95e   :  { %1113 = vmax.xlane.f32.xlu1 %v1112_v42 }
 0x9eb   :  { %v1114_v43 = vpop.xlane.xlu1 %1113 }
 0x9ec   :  { %v1115_v44 = vsub.f32 %v1111_v41, %v1114_v43 }
 0x9ee   :  { %v1116_v20 = vmul.f32 1.442695, %v1115_v44 }
 0x9f0   :  { %1313 = vpow2.f32 %v1116_v20 }
 0x9fa   :  { %v1314_v45 = vpop.eup %1313 }
 0x9fb   :  { %v1118_v46 = vsel %vm819_vm14, %v1314_v45, 0.0 }
 0x9fc   :  { %1119 = vadd.xlane.f32.xlu0 %v1118_v46 }
 0xa89   :  { %v1120_v47 = vpop.xlane.xlu0 %1119 }
 0xa8a   :  { %1315 = vlog2.f32 %v1120_v47 }
 0xa94   :  { %v1316_v48 = vpop.eup %1315 }
 0xa95   :  { %v1122_v49 = vmul.f32 0.6931472, %v1316_v48 }
 0xa97   :  { %v1123_v50 = vsub.f32 %v1115_v44, %v1122_v49 }
 0xa99   :  { %1124 = vst.msk [vmem:[%s1567_s10] sm:$0xff] %vm819_vm14, %v1123_v50 }

</bundles_post_ra>
